<compile_context>
chip_gen: v5e
topology: v5e:2x2
jax: 0.10.0
libtpu: 0.0.40
codegen_flags: <defaults>
</compile_context>

<pallas_src>
import functools

import jax
import jax.numpy as jnp
from jax.experimental import pallas as pl
from jax.experimental.pallas import tpu as pltpu

EPS = 1e-5  # PyTorch nn.LayerNorm default


def _round_up(x, m):
    return (x + m - 1) // m * m


def _prenorm_kernel(x_ref, gamma_ref, beta_ref, wt_ref, b_ref, o_ref):
    """One tile of rows: LayerNorm over last dim, then Linear (xn @ W^T + b).

    wt_ref holds W already transposed to (D_in, D_out), so the contraction is
    a plain row-major matmul with no in-kernel transpose.
    gamma/beta/bias arrive pre-cast to f32 (done once in the wrapper).
    """
    x = x_ref[...].astype(jnp.float32)                      # (tm, D)

    # --- LayerNorm over last axis (biased variance, like torch) ---
    mean = jnp.mean(x, axis=-1, keepdims=True)              # (tm, 1)
    xc = x - mean
    var = jnp.mean(xc * xc, axis=-1, keepdims=True)         # (tm, 1)
    inv = jax.lax.rsqrt(var + EPS)
    xn = xc * inv * gamma_ref[...] + beta_ref[...]          # (tm, D), f32

    # --- fn: Linear(dim, dim):  y = xn @ W^T + b ---
    # Feed the MXU in the weight's native dtype (bf16 weights -> bf16 MXU),
    # accumulate in f32.
    y = jnp.dot(xn.astype(wt_ref.dtype), wt_ref[...],
                preferred_element_type=jnp.float32)
    y = y + b_ref[...]

    o_ref[...] = y.astype(o_ref.dtype)


def _pick_block_rows(m_rows, d, itemsize, requested):
    """Largest row tile (multiple of 16) whose double-buffered x/out tiles fit
    a conservative VMEM budget valid on v7x (64 MiB physical) as well."""
    budget = 24 * 1024 * 1024                       # for x + out, 2x buffered
    per_row = max(1, d * itemsize * 4)              # (x + out) * double-buffer
    max_rows = max(16, (budget // per_row) // 16 * 16)
    br = min(requested, max_rows)
    br = min(br, _round_up(m_rows, 16))             # don't tile past the data
    return max(16, br)


@functools.partial(jax.jit, static_argnames=("block_rows",))
def prenorm(x, gamma, beta, w, b, *, block_rows=512):
    """x: (B, N, D). Returns fn(LayerNorm(x)) with fn = Linear(D, D).

    w follows the torch.nn.Linear convention: shape (D_out, D_in).
    """
    B, N, D = x.shape
    M = B * N

    tm = _pick_block_rows(M, D, jnp.dtype(x.dtype).itemsize, block_rows)
    n_tiles = pl.cdiv(M, tm)
    M_pad = n_tiles * tm

    x2 = x.reshape(M, D)
    if M_pad != M:
        x2 = jnp.pad(x2, ((0, M_pad - M), (0, 0)))

    # Hoist all per-parameter work out of the sequential grid loop:
    #  * transpose W once (kernel sees (D_in, D_out))
    #  * cast gamma/beta/bias to f32 once
    wt = jnp.transpose(w)                            # (D_in, D_out), native dtype
    gamma2 = gamma.reshape(1, D).astype(jnp.float32)
    beta2 = beta.reshape(1, D).astype(jnp.float32)
    b2 = b.reshape(1, D).astype(jnp.float32)

    out2 = pl.pallas_call(
        _prenorm_kernel,
        out_shape=jax.ShapeDtypeStruct((M_pad, D), x.dtype),
        grid_spec=pltpu.PrefetchScalarGridSpec(
            num_scalar_prefetch=0,
            grid=(n_tiles,),
            in_specs=[
                pl.BlockSpec((tm, D), lambda i: (i, 0)),   # x rows
                pl.BlockSpec((1, D), lambda i: (0, 0)),    # gamma (f32)
                pl.BlockSpec((1, D), lambda i: (0, 0)),    # beta  (f32)
                pl.BlockSpec((D, D), lambda i: (0, 0)),    # W^T, resident
                pl.BlockSpec((1, D), lambda i: (0, 0)),    # bias  (f32)
            ],
            out_specs=pl.BlockSpec((tm, D), lambda i: (i, 0)),
        ),
        compiler_params=pltpu.CompilerParams(
            dimension_semantics=("parallel",),
            vmem_limit_bytes=48 * 1024 * 1024,
        ),
    )(x2, gamma2, beta2, wt, b2)

    return out2[:M].reshape(B, N, D)


def prenorm_ref(x, gamma, beta, w, b):
    """Pure-JAX reference matching torch: Linear(LayerNorm(x))."""
    xf = x.astype(jnp.float32)
    mean = jnp.mean(xf, axis=-1, keepdims=True)
    var = jnp.mean((xf - mean) ** 2, axis=-1, keepdims=True)
    xn = (xf - mean) * jax.lax.rsqrt(var + EPS) * gamma + beta
    y = jnp.dot(xn, w.astype(jnp.float32).T,
                precision=jax.lax.Precision.HIGHEST) + b
    return y.astype(x.dtype)


if __name__ == "__main__":
    # Small ViT-like shapes: batch=2, tokens=8, dim=128 (lane-dense last dim).
    B, N, D = 2, 8, 128
    key = jax.random.PRNGKey(0)
    kx, kw, kb = jax.random.split(key, 3)

    x = jax.random.normal(kx, (B, N, D), dtype=jnp.float32)
    # nn.LayerNorm(dim) init: weight=1, bias=0
    gamma = jnp.ones((D,), dtype=jnp.float32)
    beta = jnp.zeros((D,), dtype=jnp.float32)
    # fn = Linear(dim, dim), deterministic init (torch convention: (out, in))
    w = jax.random.normal(kw, (D, D), dtype=jnp.float32) * 0.02
    b = jax.random.normal(kb, (D,), dtype=jnp.float32) * 0.01

    out = prenorm(x, gamma, beta, w, b)
    out = jax.block_until_ready(out)

    ref = prenorm_ref(x, gamma, beta, w, b)
    assert out.shape == (B, N, D)
    assert jnp.allclose(out, ref, atol=1e-4, rtol=1e-4), "mismatch vs reference"

    print("KERNEL_OK")
</pallas_src>

<mosaic_0001>
module attributes {stable_mosaic.version = 11 : i64} {
  func.func @_prenorm_kernel(%arg0: i32, %arg1: memref<16x128xf32, #tpu.memory_space<vmem>>, %arg2: memref<1x128xf32, #tpu.memory_space<vmem>>, %arg3: memref<1x128xf32, #tpu.memory_space<vmem>>, %arg4: memref<128x128xf32, #tpu.memory_space<vmem>>, %arg5: memref<1x128xf32, #tpu.memory_space<vmem>>, %arg6: memref<16x128xf32, #tpu.memory_space<vmem>>) attributes {dimension_semantics = [#tpu.dimension_semantics<parallel>], iteration_bounds = array<i64: 1>, scalar_prefetch = 0 : i64, scratch_operands = 0 : i64, tpu.core_type = #tpu.core_type<tc>, window_params = [{transform_indices = @transform_0, window_bounds = array<i64: 16, 128>}, {pipeline_mode = #tpu.pipeline_mode<synchronous>, transform_indices = @transform_1, window_bounds = array<i64: 1, 128>}, {pipeline_mode = #tpu.pipeline_mode<synchronous>, transform_indices = @transform_2, window_bounds = array<i64: 1, 128>}, {pipeline_mode = #tpu.pipeline_mode<synchronous>, transform_indices = @transform_3, window_bounds = array<i64: 128, 128>}, {pipeline_mode = #tpu.pipeline_mode<synchronous>, transform_indices = @transform_4, window_bounds = array<i64: 1, 128>}, {transform_indices = @transform_5, window_bounds = array<i64: 16, 128>}]} {
    %c0 = arith.constant 0 : index
    %c0_0 = arith.constant 0 : index
    %0 = vector.load %arg1[%c0, %c0_0] : memref<16x128xf32, #tpu.memory_space<vmem>>, vector<16x128xf32>
    %cst = arith.constant dense<0.000000e+00> : vector<16xf32>
    %1 = vector.multi_reduction <add>, %0, %cst [1] : vector<16x128xf32> to vector<16xf32>
    %2 = vector.shape_cast %1 : vector<16xf32> to vector<16x1xf32>
    %cst_1 = arith.constant 1.280000e+02 : f32
    %3 = vector.broadcast %cst_1 : f32 to vector<16x1xf32>
    %4 = arith.divf %2, %3 : vector<16x1xf32>
    %5 = vector.broadcast %4 : vector<16x1xf32> to vector<16x128xf32>
    %6 = arith.subf %0, %5 : vector<16x128xf32>
    %7 = arith.mulf %6, %6 : vector<16x128xf32>
    %cst_2 = arith.constant dense<0.000000e+00> : vector<16xf32>
    %8 = vector.multi_reduction <add>, %7, %cst_2 [1] : vector<16x128xf32> to vector<16xf32>
    %9 = vector.shape_cast %8 : vector<16xf32> to vector<16x1xf32>
    %cst_3 = arith.constant 1.280000e+02 : f32
    %10 = vector.broadcast %cst_3 : f32 to vector<16x1xf32>
    %11 = arith.divf %9, %10 : vector<16x1xf32>
    %cst_4 = arith.constant 9.99999974E-6 : f32
    %12 = vector.broadcast %cst_4 : f32 to vector<16x1xf32>
    %13 = arith.addf %11, %12 : vector<16x1xf32>
    %14 = math.rsqrt %13 : vector<16x1xf32>
    %15 = vector.broadcast %14 : vector<16x1xf32> to vector<16x128xf32>
    %16 = arith.mulf %6, %15 : vector<16x128xf32>
    %c0_5 = arith.constant 0 : index
    %c0_6 = arith.constant 0 : index
    %17 = vector.load %arg2[%c0_5, %c0_6] : memref<1x128xf32, #tpu.memory_space<vmem>>, vector<1x128xf32>
    %18 = vector.broadcast %17 : vector<1x128xf32> to vector<16x128xf32>
    %19 = arith.mulf %16, %18 : vector<16x128xf32>
    %c0_7 = arith.constant 0 : index
    %c0_8 = arith.constant 0 : index
    %20 = vector.load %arg3[%c0_7, %c0_8] : memref<1x128xf32, #tpu.memory_space<vmem>>, vector<1x128xf32>
    %21 = vector.broadcast %20 : vector<1x128xf32> to vector<16x128xf32>
    %22 = arith.addf %19, %21 : vector<16x128xf32>
    %c0_9 = arith.constant 0 : index
    %c0_10 = arith.constant 0 : index
    %23 = vector.load %arg4[%c0_9, %c0_10] : memref<128x128xf32, #tpu.memory_space<vmem>>, vector<128x128xf32>
    %cst_11 = arith.constant dense<0.000000e+00> : vector<16x128xf32>
    %24 = tpu.matmul %22, %23, %cst_11 {dimension_numbers = #tpu.dot_dimension_numbers<[1], [0], [0], [1], [0, 0, 1, 1], [], []>} : vector<16x128xf32>, vector<128x128xf32>, vector<16x128xf32> -> vector<16x128xf32>
    %c0_12 = arith.constant 0 : index
    %c0_13 = arith.constant 0 : index
    %25 = vector.load %arg5[%c0_12, %c0_13] : memref<1x128xf32, #tpu.memory_space<vmem>>, vector<1x128xf32>
    %26 = vector.broadcast %25 : vector<1x128xf32> to vector<16x128xf32>
    %27 = arith.addf %24, %26 : vector<16x128xf32>
    %c0_14 = arith.constant 0 : index
    %c0_15 = arith.constant 0 : index
    %28 = vector.load %arg6[%c0_14, %c0_15] : memref<16x128xf32, #tpu.memory_space<vmem>>, vector<16x128xf32>
    tpu.vector_store %arg6[%c0_14, %c0_15], %27 {strides = array<i32>} : memref<16x128xf32, #tpu.memory_space<vmem>>, vector<16x128xf32>,
    return
  }
  func.func @transform_0(%arg0: i32) -> (i32, i32) {
    %c0_i32 = arith.constant 0 : i32
    %c0_i32_0 = arith.constant 0 : i32
    return %arg0, %c0_i32 : i32, i32
  }
  func.func @transform_1(%arg0: i32) -> (i32, i32) {
    %c0_i32 = arith.constant 0 : i32
    %c0_i32_0 = arith.constant 0 : i32
    %c0_i32_1 = arith.constant 0 : i32
    return %c0_i32, %c0_i32_0 : i32, i32
  }
  func.func @transform_2(%arg0: i32) -> (i32, i32) {
    %c0_i32 = arith.constant 0 : i32
    %c0_i32_0 = arith.constant 0 : i32
    %c0_i32_1 = arith.constant 0 : i32
    return %c0_i32, %c0_i32_0 : i32, i32
  }
  func.func @transform_3(%arg0: i32) -> (i32, i32) {
    %c0_i32 = arith.constant 0 : i32
    %c0_i32_0 = arith.constant 0 : i32
    %c0_i32_1 = arith.constant 0 : i32
    return %c0_i32, %c0_i32_0 : i32, i32
  }
  func.func @transform_4(%arg0: i32) -> (i32, i32) {
    %c0_i32 = arith.constant 0 : i32
    %c0_i32_0 = arith.constant 0 : i32
    %c0_i32_1 = arith.constant 0 : i32
    return %c0_i32, %c0_i32_0 : i32, i32
  }
  func.func @transform_5(%arg0: i32) -> (i32, i32) {
    %c0_i32 = arith.constant 0 : i32
    %c0_i32_0 = arith.constant 0 : i32
    return %arg0, %c0_i32 : i32, i32
  }
}

</mosaic_0001>

<bundles_post_ra>
// kernel: prenorm.1
= control target key start
LH: loop header
LB: loop body
LE: loop exit
PB: predicated region body
PF: predicated region fallthrough
CT: control target
= control target key end

     0   :  { %s310_s0 = inlined_call_operand.vmem [shape: f32[16,128], index: 0, kind: input, shape index: {}]   ;;  %s311_s1 = inlined_call_operand.vmem [shape: f32[1,128], index: 1, kind: input, shape index: {}]   ;;  %s312_s2 = inlined_call_operand.vmem [shape: f32[1,128], index: 2, kind: input, shape index: {}]   ;;  %s313_s3 = inlined_call_operand.vmem [shape: f32[128,128], index: 3, kind: input, shape index: {}]   ;;  %s314_s4 = inlined_call_operand.vmem [shape: f32[1,128], index: 4, kind: input, shape index: {}]   ;;  %s315_s5 = inlined_call_operand.hbm [shape: f32[16,128], index: 5, kind: output, shape index: {}]  }
   0x1   :  { %v21_v0 = vld [vmem:[%s310_s0] sm:$0xff] }
   0x2   :  { %23 = vadd.xlane.f32.xlu0 %v21_v0 }
   0x3   :  { %10 = vsyncpa [#allocation3], 0  ;;  %v22_v1 = vld [vmem:[%s310_s0 + $0x8] sm:$0xff]  ;;  %v200_v2 = vmov 128.0   ;;  %v97_v5 = vld [vmem:[%s313_s3 + $0x78] sm:$0xff]  ;;  %s133_s9 = sshll.u32 %s315_s5, 4  ;;  %s134_s9 = int_to_ptr.hbm [resolvable:$true] %s133_s9 }
   0x4   :  { %168 = vrcp.f32 %v200_v2  ;;  %v96_v6 = vld [vmem:[%s313_s3 + $0x70] sm:$0xff]  ;;  %102 = vmatpush.msra.mxu0 %v97_v5  ;;  %145 = vmatpush.msra.mxu1 %v97_v5  ;;  %v95_v19 = vld [vmem:[%s313_s3 + $0x68] sm:$0xff]  ;;  %v94_v20 = vld [vmem:[%s313_s3 + $0x60] sm:$0xff]  ;;  %s202_s10 = smov 128   ;;  %s203_s11 = smov 8  }
   0x5   :  { %v93_v21 = vld [vmem:[%s313_s3 + $0x58] sm:$0xff]  ;;  %v92_v22 = vld [vmem:[%s313_s3 + $0x50] sm:$0xff]  ;;  %v91_v23 = vld [vmem:[%s313_s3 + $0x48] sm:$0xff] }
   0x6   :  { %103 = vmatpush.msra.mxu0 %v96_v6  ;;  %146 = vmatpush.msra.mxu1 %v96_v6  ;;  %v90_v24 = vld [vmem:[%s313_s3 + $0x40] sm:$0xff]  ;;  %v89_v25 = vld [vmem:[%s313_s3 + $0x38] sm:$0xff]  ;;  %v88_v26 = vld [vmem:[%s313_s3 + $0x30] sm:$0xff] }
   0x7   :  { %v87_v27 = vld [vmem:[%s313_s3 + $0x28] sm:$0xff]  ;;  %v86_v28 = vld [vmem:[%s313_s3 + $0x20] sm:$0xff]  ;;  %v85_v29 = vld [vmem:[%s313_s3 + $0x18] sm:$0xff] }
   0x8   :  { %104 = vmatpush.msra.mxu0 %v95_v19  ;;  %147 = vmatpush.msra.mxu1 %v95_v19  ;;  %v84_v30 = vld [vmem:[%s313_s3 + $0x10] sm:$0xff]  ;;  %v83_v31 = vld [vmem:[%s313_s3 + $0x8] sm:$0xff]  ;;  %v82_v32 = vld [vmem:[%s313_s3] sm:$0xff] }
   0x9   :  { %v165_v47 = vld [vmem:[%s311_s1] ss:$0 sm:$0xff] }
   0xa   :  { %25 = vadd.xlane.f32.xlu0 %v22_v1  ;;  %v169_v3 = vpop.eup %168  ;;  %105 = vmatpush.msra.mxu0 %v94_v20  ;;  %v166_v51 = vld [vmem:[%s312_s2] ss:$0 sm:$0xff]  ;;  %s201_s2 = smov [#allocation2]  }
   0xb   :  { %v28_v4 = vmul.f32 128.0, %v169_v3  ;;  %vm32_vm0 = vweird.f32 %v169_v3  ;;  %148 = vmatpush.msra.mxu1 %v94_v20  ;;  %v167_v61 = vld [vmem:[%s314_s4] ss:$0 sm:$0xff]  ;;  %s131_s6 = sshll.u32 %s201_s2, 4  ;;  %s132_s6 = int_to_ptr.vmem [resolvable:$true] %s131_s6 }
   0xc   :  { %106 = vmatpush.msra.mxu0 %v93_v21 }
   0xd   :  { %v29_v7 = vsub.f32 1.0, %v28_v4  ;;  %149 = vmatpush.msra.mxu1 %v93_v21 }
   0xe   :  { %107 = vmatpush.msra.mxu0 %v92_v22 }
   0xf   :  { %v30_v8 = vmul.f32 %v169_v3, %v29_v7  ;;  %150 = vmatpush.msra.mxu1 %v92_v22 }
  0x10   :  { %108 = vmatpush.msra.mxu0 %v91_v23 }
  0x11   :  { %v31_v9 = vadd.f32 %v169_v3, %v30_v8  ;;  %151 = vmatpush.msra.mxu1 %v91_v23 }
  0x12   :  { %109 = vmatpush.msra.mxu0 %v90_v24 }
  0x13   :  { %v33_v10 = vsel %vm32_vm0, %v169_v3, %v31_v9  ;;  %152 = vmatpush.msra.mxu1 %v90_v24 }
  0x14   :  { %110 = vmatpush.msra.mxu0 %v89_v25 }
  0x15   :  { %153 = vmatpush.msra.mxu1 %v89_v25 }
  0x16   :  { %111 = vmatpush.msra.mxu0 %v88_v26 }
  0x17   :  { %154 = vmatpush.msra.mxu1 %v88_v26 }
  0x18   :  { %112 = vmatpush.msra.mxu0 %v87_v27 }
  0x19   :  { %155 = vmatpush.msra.mxu1 %v87_v27 }
  0x1a   :  { %113 = vmatpush.msra.mxu0 %v86_v28 }
  0x1b   :  { %156 = vmatpush.msra.mxu1 %v86_v28 }
  0x1c   :  { %114 = vmatpush.msra.mxu0 %v85_v29 }
  0x1d   :  { %157 = vmatpush.msra.mxu1 %v85_v29 }
  0x1e   :  { %115 = vmatpush.msra.mxu0 %v84_v30 }
  0x1f   :  { %158 = vmatpush.msra.mxu1 %v84_v30 }
  0x20   :  { %116 = vmatpush.msra.mxu0 %v83_v31 }
  0x21   :  { %159 = vmatpush.msra.mxu1 %v83_v31 }
  0x22   :  { %117 = vmatpush.msra.mxu0 %v82_v32 }
  0x23   :  { %160 = vmatpush.msra.mxu1 %v82_v32 }
  0x75   :  { %v24_v11 = vpop.xlane.xlu0 %23 }
  0x76   :  { %v34_v12 = vmul.f32 %v33_v10, %v24_v11 }
  0x78   :  { %v246_v13 = vsub.f32 %v21_v0, %v34_v12 }
  0x7a   :  { %v38_v14 = vmul.f32 %v246_v13, %v246_v13 }
  0x7c   :  { %40 = vadd.xlane.f32.xlu1 %v38_v14 }
  0x7d   :  { %v26_v15 = vpop.xlane.xlu0 %25 }
  0x7e   :  { %v35_v16 = vmul.f32 %v33_v10, %v26_v15 }
  0x80   :  { %v250_v17 = vsub.f32 %v22_v1, %v35_v16 }
  0x82   :  { %v39_v18 = vmul.f32 %v250_v17, %v250_v17 }
  0x84   :  { %42 = vadd.xlane.f32.xlu1 %v39_v18 }
  0xef   :  { %v41_v33 = vpop.xlane.xlu1 %40 }
  0xf0   :  { %v44_v34 = vmul.f32 %v41_v33, %v33_v10 }
  0xf2   :  { %v46_v35 = vadd.f32 1e-05, %v44_v34 }
  0xf4   :  { %170 = vrsqrt.f32 %v46_v35  ;;  %vm54_vm2 = vweird.f32 %v46_v35 }
  0xf7   :  { %v43_v36 = vpop.xlane.xlu1 %42 }
  0xf8   :  { %v45_v37 = vmul.f32 %v43_v36, %v33_v10 }
  0xfa   :  { %v171_v38 = vpop.eup %170  ;;  %v47_v39 = vadd.f32 1e-05, %v45_v37 }
  0xfb   :  { %v49_v40 = vmul.f32 %v171_v38, %v46_v35  ;;  %vm55_vm1 = vweird.f32 %v171_v38 }
  0xfc   :  { %172 = vrsqrt.f32 %v47_v39  ;;  %vm56_vm3 = vmor %vm54_vm2, %vm55_vm1  ;;  %vm64_vm5 = vweird.f32 %v47_v39 }
  0xfd   :  { %v50_v41 = vmul.f32 %v171_v38, %v49_v40 }
  0xff   :  { %v51_v42 = vmul.f32 0.5, %v50_v41 }
 0x101   :  { %v52_v43 = vsub.f32 1.5, %v51_v42 }
 0x102   :  { %v173_v44 = vpop.eup %172 }
 0x103   :  { %v53_v45 = vmul.f32 %v171_v38, %v52_v43  ;;  %v59_v46 = vmul.f32 %v173_v44, %v47_v39  ;;  %vm65_vm4 = vweird.f32 %v173_v44 }
 0x104   :  { %vm66_vm6 = vmor %vm64_vm5, %vm65_vm4 }
 0x105   :  { %v60_v48 = vmul.f32 %v173_v44, %v59_v46  ;;  %v57_v49 = vsel %vm56_vm3, %v171_v38, %v53_v45 }
 0x106   :  { %v68_v50 = vmul.f32 %v57_v49, %v246_v13 }
 0x107   :  { %v61_v52 = vmul.f32 0.5, %v60_v48 }
 0x108   :  { %v74_v53 = vmul.f32 %v165_v47, %v68_v50 }
 0x109   :  { %v62_v54 = vsub.f32 1.5, %v61_v52 }
 0x10a   :  { %v80_v55 = vadd.f32 %v166_v51, %v74_v53 }
 0x10b   :  { %v63_v56 = vmul.f32 %v173_v44, %v62_v54 }
 0x10c   :  { %118 = vmatmul.f32.vlgmr.msra.gmra.mxu0 %v80_v55 }
 0x10d   :  { %v67_v57 = vsel %vm66_vm6, %v173_v44, %v63_v56 }
 0x10e   :  { %v69_v58 = vmul.f32 %v67_v57, %v250_v17 }
 0x110   :  { %v75_v59 = vmul.f32 %v165_v47, %v69_v58 }
 0x112   :  { %v81_v60 = vadd.f32 %v166_v51, %v75_v59 }
 0x114   :  { %121 = vmatmul.f32.vlgmr.msra.gmra.mxu1 %v81_v60 }
 0x189   :  { %v119_v62 = vpop.f32.mrf.mxu0 }
 0x18a   :  { %v120_v63 = vadd.f32 %v167_v61, %v119_v62 }
 0x18c   :  { %125 = vst [vmem:[#allocation2] sm:$0xff] %v120_v63 }
 0x191   :  { %v122_v0 = vpop.f32.mrf.mxu1 }
 0x192   :  { %v123_v1 = vadd.f32 %v167_v61, %v122_v0 }
 0x194   :  { %126 = vst [vmem:[#allocation2 + $0x8] sm:$0xff] %v123_v1 }
 0x195   :  { %139 = dma.vmem_to_hbm [thread:$0]  %s132_s6, 256, %s134_s9, [#allocation3], %s202_s10, %s202_s10, %s203_s11  }
 0x196   :  { %198 = dma.done.wait [#allocation3], 256  }
 0x197   :  { %199 = vsyncadd [#allocation3], 4294967040 }
 0x198   :  { %144 = vsyncpa [#allocation3], 1 }

</bundles_post_ra>
